<compile_context>
chip_gen: v6e
topology: v6e:2x2x1
jax: 0.10.0
libtpu: 0.0.40
codegen_flags: <defaults>
</compile_context>

<pallas_src>
import jax
import jax.numpy as jnp
from jax.experimental import pallas as pl
from jax.experimental.pallas import tpu as pltpu

# ---- small but structurally faithful hyper-parameters -----------------------
SEQ_LEN = 16          # Conv1d in_channels (PyTorch convolves over the embed axis)
EMBED_SIZE = 32       # Conv1d "length" axis
VOCAB_SIZE = 45
PAD_INDEX = 0
KERNEL_SIZE = 3
STRIDE = 1
CONV_OUT = 16
HIDDEN_SIZES = [32, 16, 8, 1]
BATCH = 2

L_CONV = (EMBED_SIZE - (KERNEL_SIZE - 1) - 1) // STRIDE + 1   # 30
L_POOL = (L_CONV - (KERNEL_SIZE - 1) - 1) // STRIDE + 1       # 28 (MaxPool1d stride=1)
FLAT = L_POOL * CONV_OUT                                      # 448 (== _linear_layer_in_size)

H0 = HIDDEN_SIZES[0]                  # 32: lane width of the packed small-MLP slab
OL = CONV_OUT * EMBED_SIZE            # 512: flattened (o, l) conv-output lane axis
CINL = SEQ_LEN * EMBED_SIZE           # 512: flattened (c, l') conv-input lane axis
MLP_ROWS = 2 * H0 + 8                 # 72: w1(32) + w2(32) + bias/w3 rows (8)
TILE_B = 16                           # batch rows per grid step (raise to 128/256 for big B)


# ----------------------------------------------------------------------------
# Kernel: one batch tile per grid step; weight slabs stay VMEM-resident.
# ----------------------------------------------------------------------------
def cnn_mlp_kernel(x_ref, wconv_ref, cbias_ref, w0_ref, mlp_ref, out_ref):
    # --- Conv1d(Cin -> O, K=3, stride 1) for the whole batch tile: ONE
    # (TILE_B, 512) @ (512, 512) MXU dot with an exactly-512 contraction.
    conv = jnp.dot(x_ref[...], wconv_ref[...], preferred_element_type=jnp.float32)
    conv = jnp.maximum(conv + cbias_ref[...], 0.0)       # conv bias (VPU add) + ReLU

    # --- MaxPool1d(3, stride=1): centered 3-window max via two XLU lane rotations.
    # Lane j = o*L + l'; cross-block wrap / partial-conv lanes only land on
    # positions that get zero weight in w0 below.
    pool = jnp.maximum(conv,
                       jnp.maximum(pltpu.roll(conv, 1, axis=1),
                                   pltpu.roll(conv, OL - 1, axis=1)))

    # --- flatten + fc0 fused into ONE (TILE_B, 512) @ (512, H0) dot, f32 accumulation.
    h = jnp.dot(pool.astype(w0_ref.dtype), w0_ref[...],
                preferred_element_type=jnp.float32)

    bias = mlp_ref[2 * H0:2 * H0 + 8, :].astype(jnp.float32)   # (8, H0): b0,b1,b2,w3,b3
    h = jnp.maximum(h + bias[0:1, :], 0.0)                     # + b0, ReLU
    # TODO(synk): Dropout(p=0.25) after hidden ReLUs is eval-mode identity (omitted).

    # --- small MLP, lane-padded to H0=32 wide (zero-padded weights/biases), bf16 weights.
    h = jnp.maximum(jnp.dot(h.astype(mlp_ref.dtype), mlp_ref[0:H0, :],
                            preferred_element_type=jnp.float32) + bias[1:2, :], 0.0)
    h = jnp.maximum(jnp.dot(h.astype(mlp_ref.dtype), mlp_ref[H0:2 * H0, :],
                            preferred_element_type=jnp.float32) + bias[2:3, :], 0.0)
    # last Linear(8 -> 1): VPU multiply + lane reduce (skip an 8-wide MXU push).
    h = jnp.sum(h * bias[3:4, :], axis=-1, keepdims=True) + bias[4:5, 0:1]
    h = jnp.maximum(h, 0.0)             # spec applies ReLU after the last Linear too
    sig = pl.reciprocal(1.0 + jnp.exp(-h), approx=True)        # sigmoid (EUP)
    out_ref[...] = jnp.broadcast_to(sig, out_ref.shape)        # lane-dense (TILE_B, 128)


# ----------------------------------------------------------------------------
# Parameter construction (PyTorch shapes) and one-time kernel re-layout.
# ----------------------------------------------------------------------------
def init_params(key):
    """Deterministic parameters in the PyTorch shapes of CNN_MLP.__init__."""
    ks = jax.random.split(key, 12)
    emb = jax.random.normal(ks[0], (VOCAB_SIZE, EMBED_SIZE), jnp.float32)
    emb = emb.at[PAD_INDEX].set(0.0)                 # padding_idx row = 0

    def uni(k, shape, fan_in):
        bound = 1.0 / (fan_in ** 0.5)
        return jax.random.uniform(k, shape, jnp.float32, -bound, bound)

    conv_w = uni(ks[1], (CONV_OUT, SEQ_LEN, KERNEL_SIZE), SEQ_LEN * KERNEL_SIZE)
    conv_b = uni(ks[2], (CONV_OUT,), SEQ_LEN * KERNEL_SIZE)

    sizes = [FLAT] + HIDDEN_SIZES                    # [448, 32, 16, 8, 1]
    fcs, ki = [], 3
    for i in range(len(sizes) - 1):
        w = uni(ks[ki], (sizes[i + 1], sizes[i]), sizes[i]); ki += 1
        b = uni(ks[ki], (sizes[i + 1],), sizes[i]); ki += 1
        fcs.extend([w, b])
    return (emb, conv_w, conv_b, *fcs)


def pack_params(params):
    """One-time re-layout of PyTorch-shaped params into the kernel slabs (+bf16 emb)."""
    emb, conv_w, conv_b, w0, b0, w1, b1, w2, b2, w3, b3 = params
    Cin, L, K, O = SEQ_LEN, EMBED_SIZE, KERNEL_SIZE, CONV_OUT

    # (a) Conv1d as ONE banded matmul weight on the flattened (c*L + l') input:
    #     w_conv[c*L + l', o*L + l] = conv_w[o, c, l'-l]  for 0 <= l'-l < K, else 0.
    #     ~0.5 MiB in bf16; DMA'd once per pallas_call and VMEM-resident after that.
    shift_eye = jnp.stack([jnp.eye(L, k=-k, dtype=jnp.float32)
                           for k in range(K)])                     # [k,l',l]=1 iff l'==l+k
    band = jnp.einsum('ock,kab->caob', conv_w, shift_eye)          # (Cin, L, O, L)
    w_conv = band.reshape(Cin * L, OL)

    # conv bias as a (1, O*L) f32 row -> in-kernel VPU broadcast add (keeps conv K=512).
    cbias = jnp.repeat(conv_b, L)[None, :]

    # (b) fc0 weight re-indexed for the CENTERED pooled layout produced in-kernel:
    #     pool[b, o*L + l'] == PyTorch pooled[b, o, l'-1]  for l' in [1, L_POOL];
    #     all other lanes (window wrap / l >= L_POOL) get zero weight.
    w0r = w0.T.reshape(O, L_POOL, H0)                # [o, l, h] = w0[h, o*L_POOL + l]
    w0s = jnp.zeros((O, L, H0), jnp.float32).at[:, 1:L_POOL + 1, :].set(w0r)
    w0s = w0s.reshape(OL, H0)

    # (c) small-MLP slab, lane-padded to H0=32 wide.
    mlp = jnp.zeros((MLP_ROWS, H0), jnp.float32)
    mlp = mlp.at[0:H0, 0:w1.shape[0]].set(w1.T)                  # fc1 weight (32->16)
    mlp = mlp.at[H0:H0 + w2.shape[1], 0:w2.shape[0]].set(w2.T)   # fc2 weight (16->8)
    r = 2 * H0
    mlp = mlp.at[r + 0, 0:b0.shape[0]].set(b0)                   # b0
    mlp = mlp.at[r + 1, 0:b1.shape[0]].set(b1)                   # b1
    mlp = mlp.at[r + 2, 0:b2.shape[0]].set(b2)                   # b2
    mlp = mlp.at[r + 3, 0:w3.shape[1]].set(w3[0])                # fc3 weight row (8->1)
    mlp = mlp.at[r + 4, :].set(b3[0])                            # b3

    return (emb.astype(jnp.bfloat16),
            w_conv.astype(jnp.bfloat16),
            cbias.astype(jnp.float32),
            w0s.astype(jnp.bfloat16),
            mlp.astype(jnp.bfloat16))


# ----------------------------------------------------------------------------
# Forward pass.
# ----------------------------------------------------------------------------
@jax.jit
def cnn_mlp_forward(tokens, packed):
    emb, w_conv, cbias, w0s, mlp = packed
    B = tokens.shape[0]
    num_tiles = pl.cdiv(B, TILE_B)
    B_pad = num_tiles * TILE_B

    # Embedding gather (glue, plain JAX), flattened to the (c*L + l) layout the
    # banded conv weight expects; bf16 table => bf16 activations, zero-padded batch.
    x = emb[tokens].reshape(B, CINL)
    x = jnp.zeros((B_pad, CINL), x.dtype).at[:B, :].set(x)

    out = pl.pallas_call(
        cnn_mlp_kernel,
        grid=(num_tiles,),
        in_specs=[
            pl.BlockSpec((TILE_B, CINL), lambda i: (i, 0)),    # x: pipelined over batch
            pl.BlockSpec((CINL, OL), lambda i: (0, 0)),        # conv weight: resident
            pl.BlockSpec((1, OL), lambda i: (0, 0)),           # conv bias row: resident
            pl.BlockSpec((OL, H0), lambda i: (0, 0)),          # fc0 weight: resident
            pl.BlockSpec((MLP_ROWS, H0), lambda i: (0, 0)),    # small-MLP slab: resident
        ],
        out_specs=pl.BlockSpec((TILE_B, 128), lambda i: (i, 0)),
        out_shape=jax.ShapeDtypeStruct((B_pad, 128), jnp.float32),
        compiler_params=pltpu.CompilerParams(
            dimension_semantics=("parallel",)),    # megacore batch sharding on v7x
    )(x, w_conv, cbias, w0s, mlp)
    return out[:B, 0]                              # torch .squeeze(): (B,1)->(B,)


# ----------------------------------------------------------------------------
# Pure-JAX reference (PyTorch semantics) for a loose numerical self-check.
# ----------------------------------------------------------------------------
def reference_forward(tokens, params):
    emb, conv_w, conv_b, w0, b0, w1, b1, w2, b2, w3, b3 = params
    x = emb[tokens]                                              # (B, Cin, L)
    conv = conv_b[None, :, None] + sum(
        jnp.einsum('bcl,oc->bol', x[:, :, k:k + L_CONV], conv_w[:, :, k])
        for k in range(KERNEL_SIZE))
    conv = jnp.maximum(conv, 0.0)
    pool = conv[:, :, :L_POOL]
    for k in range(1, KERNEL_SIZE):
        pool = jnp.maximum(pool, conv[:, :, k:k + L_POOL])
    h = pool.reshape(tokens.shape[0], -1)                        # (B, O*L_POOL)
    for w, b in ((w0, b0), (w1, b1), (w2, b2), (w3, b3)):
        h = jnp.maximum(h @ w.T + b, 0.0)                        # ReLU after every Linear
    return jax.nn.sigmoid(h)[:, 0]


if __name__ == "__main__":
    key = jax.random.PRNGKey(0)
    pkey, tkey = jax.random.split(key)
    params = init_params(pkey)
    packed = pack_params(params)
    tokens = jax.random.randint(tkey, (BATCH, SEQ_LEN), 0, VOCAB_SIZE,
                                dtype=jnp.int32)

    out = cnn_mlp_forward(tokens, packed)
    jax.block_until_ready(out)
    assert out.shape == (BATCH,) and out.dtype == jnp.float32

    ref = reference_forward(tokens, params)
    max_err = float(jnp.max(jnp.abs(out - ref)))
    assert max_err < 2e-2, f"kernel vs reference mismatch: {max_err}"
    print("KERNEL_OK")
</pallas_src>

<mosaic_0001>
module attributes {stable_mosaic.version = 11 : i64} {
  func.func @cnn_mlp_kernel(%arg0: i32, %arg1: memref<16x512xbf16, #tpu.memory_space<vmem>>, %arg2: memref<512x512xbf16, #tpu.memory_space<vmem>>, %arg3: memref<1x512xf32, #tpu.memory_space<vmem>>, %arg4: memref<512x32xbf16, #tpu.memory_space<vmem>>, %arg5: memref<72x32xbf16, #tpu.memory_space<vmem>>, %arg6: memref<16x128xf32, #tpu.memory_space<vmem>>) attributes {dimension_semantics = [#tpu.dimension_semantics<parallel>], iteration_bounds = array<i64: 1>, scalar_prefetch = 0 : i64, scratch_operands = 0 : i64, tpu.core_type = #tpu.core_type<tc>, window_params = [{transform_indices = @transform_0, window_bounds = array<i64: 16, 512>}, {pipeline_mode = #tpu.pipeline_mode<synchronous>, transform_indices = @transform_1, window_bounds = array<i64: 512, 512>}, {pipeline_mode = #tpu.pipeline_mode<synchronous>, transform_indices = @transform_2, window_bounds = array<i64: 1, 512>}, {pipeline_mode = #tpu.pipeline_mode<synchronous>, transform_indices = @transform_3, window_bounds = array<i64: 512, 32>}, {pipeline_mode = #tpu.pipeline_mode<synchronous>, transform_indices = @transform_4, window_bounds = array<i64: 72, 32>}, {transform_indices = @transform_5, window_bounds = array<i64: 16, 128>}]} {
    %c0 = arith.constant 0 : index
    %c0_0 = arith.constant 0 : index
    %0 = vector.load %arg1[%c0, %c0_0] : memref<16x512xbf16, #tpu.memory_space<vmem>>, vector<16x512xbf16>
    %c0_1 = arith.constant 0 : index
    %c0_2 = arith.constant 0 : index
    %1 = vector.load %arg2[%c0_1, %c0_2] : memref<512x512xbf16, #tpu.memory_space<vmem>>, vector<512x512xbf16>
    %cst = arith.constant dense<0.000000e+00> : vector<16x512xf32>
    %2 = tpu.matmul %0, %1, %cst {dimension_numbers = #tpu.dot_dimension_numbers<[1], [0], [0], [1], [0, 0, 1, 1], [], []>} : vector<16x512xbf16>, vector<512x512xbf16>, vector<16x512xf32> -> vector<16x512xf32>
    %c0_3 = arith.constant 0 : index
    %c0_4 = arith.constant 0 : index
    %3 = vector.load %arg3[%c0_3, %c0_4] : memref<1x512xf32, #tpu.memory_space<vmem>>, vector<1x512xf32>
    %4 = vector.broadcast %3 : vector<1x512xf32> to vector<16x512xf32>
    %5 = arith.addf %2, %4 : vector<16x512xf32>
    %cst_5 = arith.constant 0.000000e+00 : f32
    %6 = vector.broadcast %cst_5 : f32 to vector<16x512xf32>
    %7 = arith.maximumf %5, %6 : vector<16x512xf32>
    %c1_i32 = arith.constant 1 : i32
    %8 = tpu.dynamic_rotate %7 by %c1_i32 dim 1 : vector<16x512xf32>, i32 -> vector<16x512xf32>
    %c511_i32 = arith.constant 511 : i32
    %9 = tpu.dynamic_rotate %7 by %c511_i32 dim 1 : vector<16x512xf32>, i32 -> vector<16x512xf32>
    %10 = arith.maximumf %8, %9 : vector<16x512xf32>
    %11 = arith.maximumf %7, %10 : vector<16x512xf32>
    %12 = arith.truncf %11 : vector<16x512xf32> to vector<16x512xbf16>
    %c0_6 = arith.constant 0 : index
    %c0_7 = arith.constant 0 : index
    %13 = vector.load %arg4[%c0_6, %c0_7] : memref<512x32xbf16, #tpu.memory_space<vmem>>, vector<512x32xbf16>
    %cst_8 = arith.constant dense<0.000000e+00> : vector<16x32xf32>
    %14 = tpu.matmul %12, %13, %cst_8 {dimension_numbers = #tpu.dot_dimension_numbers<[1], [0], [0], [1], [0, 0, 1, 1], [], []>} : vector<16x512xbf16>, vector<512x32xbf16>, vector<16x32xf32> -> vector<16x32xf32>
    %c64 = arith.constant 64 : index
    %c0_9 = arith.constant 0 : index
    %15 = vector.load %arg5[%c64, %c0_9] : memref<72x32xbf16, #tpu.memory_space<vmem>>, vector<8x32xbf16>
    %16 = arith.extf %15 : vector<8x32xbf16> to vector<8x32xf32>
    %17 = vector.extract_strided_slice %16 {offsets = [0, 0], sizes = [1, 32], strides = [1, 1]} : vector<8x32xf32> to vector<1x32xf32>
    %18 = vector.broadcast %17 : vector<1x32xf32> to vector<16x32xf32>
    %19 = arith.addf %14, %18 : vector<16x32xf32>
    %cst_10 = arith.constant 0.000000e+00 : f32
    %20 = vector.broadcast %cst_10 : f32 to vector<16x32xf32>
    %21 = arith.maximumf %19, %20 : vector<16x32xf32>
    %22 = arith.truncf %21 : vector<16x32xf32> to vector<16x32xbf16>
    %c0_11 = arith.constant 0 : index
    %c0_12 = arith.constant 0 : index
    %23 = vector.load %arg5[%c0_11, %c0_12] : memref<72x32xbf16, #tpu.memory_space<vmem>>, vector<32x32xbf16>
    %cst_13 = arith.constant dense<0.000000e+00> : vector<16x32xf32>
    %24 = tpu.matmul %22, %23, %cst_13 {dimension_numbers = #tpu.dot_dimension_numbers<[1], [0], [0], [1], [0, 0, 1, 1], [], []>} : vector<16x32xbf16>, vector<32x32xbf16>, vector<16x32xf32> -> vector<16x32xf32>
    %25 = vector.extract_strided_slice %16 {offsets = [1, 0], sizes = [1, 32], strides = [1, 1]} : vector<8x32xf32> to vector<1x32xf32>
    %26 = vector.broadcast %25 : vector<1x32xf32> to vector<16x32xf32>
    %27 = arith.addf %24, %26 : vector<16x32xf32>
    %cst_14 = arith.constant 0.000000e+00 : f32
    %28 = vector.broadcast %cst_14 : f32 to vector<16x32xf32>
    %29 = arith.maximumf %27, %28 : vector<16x32xf32>
    %30 = arith.truncf %29 : vector<16x32xf32> to vector<16x32xbf16>
    %c32 = arith.constant 32 : index
    %c0_15 = arith.constant 0 : index
    %31 = vector.load %arg5[%c32, %c0_15] : memref<72x32xbf16, #tpu.memory_space<vmem>>, vector<32x32xbf16>
    %cst_16 = arith.constant dense<0.000000e+00> : vector<16x32xf32>
    %32 = tpu.matmul %30, %31, %cst_16 {dimension_numbers = #tpu.dot_dimension_numbers<[1], [0], [0], [1], [0, 0, 1, 1], [], []>} : vector<16x32xbf16>, vector<32x32xbf16>, vector<16x32xf32> -> vector<16x32xf32>
    %33 = vector.extract_strided_slice %16 {offsets = [2, 0], sizes = [1, 32], strides = [1, 1]} : vector<8x32xf32> to vector<1x32xf32>
    %34 = vector.broadcast %33 : vector<1x32xf32> to vector<16x32xf32>
    %35 = arith.addf %32, %34 : vector<16x32xf32>
    %cst_17 = arith.constant 0.000000e+00 : f32
    %36 = vector.broadcast %cst_17 : f32 to vector<16x32xf32>
    %37 = arith.maximumf %35, %36 : vector<16x32xf32>
    %38 = vector.extract_strided_slice %16 {offsets = [3, 0], sizes = [1, 32], strides = [1, 1]} : vector<8x32xf32> to vector<1x32xf32>
    %39 = vector.broadcast %38 : vector<1x32xf32> to vector<16x32xf32>
    %40 = arith.mulf %37, %39 : vector<16x32xf32>
    %cst_18 = arith.constant dense<0.000000e+00> : vector<16xf32>
    %41 = vector.multi_reduction <add>, %40, %cst_18 [1] : vector<16x32xf32> to vector<16xf32>
    %42 = vector.shape_cast %41 : vector<16xf32> to vector<16x1xf32>
    %43 = vector.extract_strided_slice %16 {offsets = [4, 0], sizes = [1, 1], strides = [1, 1]} : vector<8x32xf32> to vector<1x1xf32>
    %44 = vector.broadcast %43 : vector<1x1xf32> to vector<16x1xf32>
    %45 = arith.addf %42, %44 : vector<16x1xf32>
    %cst_19 = arith.constant 0.000000e+00 : f32
    %46 = vector.broadcast %cst_19 : f32 to vector<16x1xf32>
    %47 = arith.maximumf %45, %46 : vector<16x1xf32>
    %cst_20 = arith.constant 0.000000e+00 : f32
    %48 = vector.broadcast %cst_20 : f32 to vector<16x1xf32>
    %49 = arith.subf %48, %47 : vector<16x1xf32>
    %50 = math.exp %49 : vector<16x1xf32>
    %cst_21 = arith.constant 1.000000e+00 : f32
    %51 = vector.broadcast %cst_21 : f32 to vector<16x1xf32>
    %52 = arith.addf %51, %50 : vector<16x1xf32>
    %53 = tpu.reciprocal %52 {approx = true} : vector<16x1xf32> -> vector<16x1xf32>
    %54 = vector.shape_cast %53 : vector<16x1xf32> to vector<16x1xf32>
    %55 = vector.broadcast %54 : vector<16x1xf32> to vector<16x128xf32>
    %c0_22 = arith.constant 0 : index
    %c0_23 = arith.constant 0 : index
    %56 = vector.load %arg6[%c0_22, %c0_23] : memref<16x128xf32, #tpu.memory_space<vmem>>, vector<16x128xf32>
    tpu.vector_store %arg6[%c0_22, %c0_23], %55 {strides = array<i32>} : memref<16x128xf32, #tpu.memory_space<vmem>>, vector<16x128xf32>,
    return
  }
  func.func @transform_0(%arg0: i32) -> (i32, i32) {
    %c0_i32 = arith.constant 0 : i32
    %c0_i32_0 = arith.constant 0 : i32
    return %arg0, %c0_i32 : i32, i32
  }
  func.func @transform_1(%arg0: i32) -> (i32, i32) {
    %c0_i32 = arith.constant 0 : i32
    %c0_i32_0 = arith.constant 0 : i32
    %c0_i32_1 = arith.constant 0 : i32
    return %c0_i32, %c0_i32_0 : i32, i32
  }
  func.func @transform_2(%arg0: i32) -> (i32, i32) {
    %c0_i32 = arith.constant 0 : i32
    %c0_i32_0 = arith.constant 0 : i32
    %c0_i32_1 = arith.constant 0 : i32
    return %c0_i32, %c0_i32_0 : i32, i32
  }
  func.func @transform_3(%arg0: i32) -> (i32, i32) {
    %c0_i32 = arith.constant 0 : i32
    %c0_i32_0 = arith.constant 0 : i32
    %c0_i32_1 = arith.constant 0 : i32
    return %c0_i32, %c0_i32_0 : i32, i32
  }
  func.func @transform_4(%arg0: i32) -> (i32, i32) {
    %c0_i32 = arith.constant 0 : i32
    %c0_i32_0 = arith.constant 0 : i32
    %c0_i32_1 = arith.constant 0 : i32
    return %c0_i32, %c0_i32_0 : i32, i32
  }
  func.func @transform_5(%arg0: i32) -> (i32, i32) {
    %c0_i32 = arith.constant 0 : i32
    %c0_i32_0 = arith.constant 0 : i32
    return %arg0, %c0_i32 : i32, i32
  }
}

</mosaic_0001>

<bundles_post_ra>
// kernel: cnn_mlp_forward.1
= control target key start
LH: loop header
LB: loop body
LE: loop exit
PB: predicated region body
PF: predicated region fallthrough
CT: control target
= control target key end

     0   :  { %10 = vsyncpa [#allocation3], 0  ;;  %s2179_s18 = smov [#allocation2]   ;;  %s2475_s0 = inlined_call_operand.vmem [shape: bf16[16,512], index: 0, kind: input, shape index: {}]   ;;  %s2476_s1 = inlined_call_operand.hbm [shape: bf16[512,512], index: 1, kind: input, shape index: {}]   ;;  %s2477_s2 = inlined_call_operand.vmem [shape: f32[1,512], index: 2, kind: input, shape index: {}]   ;;  %s2478_s3 = inlined_call_operand.vmem [shape: bf16[512,32], index: 3, kind: input, shape index: {}]   ;;  %s2479_s4 = inlined_call_operand.vmem [shape: bf16[72,32], index: 4, kind: input, shape index: {}]   ;;  %s2480_s5 = inlined_call_operand.vmem [shape: f32[16,128], index: 5, kind: output, shape index: {}]  }
   0x1   :  { %s18_s19 = sshll.u32 %s2179_s18, 4  ;;  %s19_s19 = int_to_ptr.vmem [resolvable:$true] %s18_s19 }
   0x2   :  { %s2165_s20 = scalar_lea.vmem %s19_s19, 16384  ;;  %p2170_p1 = scmp.lt.s32.totalorder %s19_s19, %s19_s19 }
   0x3   :  { %p2166_p0 = scmp.ne.s32.totalorder %s19_s19, %s2165_s20  ;;  %p2171_p2 = scmp.lt.s32.totalorder %s2165_s20, %s2165_s20 }
   0x5   :  { %p2172_p3 = por %p2171_p2, %p2170_p1 }
   0x7   :  { %p2173_p4 = pnand %p2172_p3, %p2166_p0 }
   0x9   :  { %2176 = shalt.err (!%p2173_p4)
}
   0xa   :  { %s2180_s21 = smov 256   ;;  %s2181_s22 = smov 16  }
   0xb   :  { %24 = dma.hbm_to_vmem [thread:$0]  %s2476_s1, 16384, %s19_s19, [#allocation3], %s2180_s21, %s2180_s21, %s2181_s22  }
   0xc   :  { %2177 = dma.done.wait [#allocation3], 16384  }
   0xd   :  { %2178 = vsyncadd [#allocation3], 4294950912  ;;  %v1915_v0 = vld [vmem:[#allocation2 + $0xe4] ss:$16 sps:$4 sm:$0xff]   ;;  %v1919_v2 = vld [vmem:[#allocation2 + $0xe0] ss:$16 sps:$4 sm:$0xff]  }
   0xe   :  { %v1917_v1 = vld [vmem:[#allocation2 + $0x2e4] ss:$16 sps:$4 sm:$0xff]   ;;  %849 = vmatprep.subr.bf16.mxu0 %v1915_v0  ;;  %v1920_v3 = vld [vmem:[#allocation2 + $0x2e0] ss:$16 sps:$4 sm:$0xff]   ;;  %v2016_v51 = vld [vmem:[%s2475_s0 + $0xc] ss:$16 sps:$4 sm:$0xff]  }
   0xf   :  { %892 = vmatprep.subr.bf16.mxu1 %v1917_v1  ;;  %v1921_v4 = vld [vmem:[#allocation2 + $0xc4] ss:$16 sps:$4 sm:$0xff]   ;;  %850 = vmatpush1.bf16.msra.mxu0 %v1919_v2  ;;  %v1925_v6 = vld [vmem:[#allocation2 + $0xc0] ss:$16 sps:$4 sm:$0xff]   ;;  %v2019_v2 = vld [vmem:[#allocation2 + $0xec] ss:$16 sps:$4 sm:$0xff]  }
  0x10   :  { %893 = vmatpush1.bf16.msra.mxu1 %v1920_v3  ;;  %v1923_v5 = vld [vmem:[#allocation2 + $0x2c4] ss:$16 sps:$4 sm:$0xff]   ;;  %851 = vmatprep.subr.bf16.mxu0 %v1921_v4  ;;  %v1926_v7 = vld [vmem:[#allocation2 + $0x2c0] ss:$16 sps:$4 sm:$0xff]   ;;  %v2022_v3 = vld [vmem:[#allocation2 + $0x2ec] ss:$16 sps:$4 sm:$0xff]  }
  0x11   :  { %894 = vmatprep.subr.bf16.mxu1 %v1923_v5  ;;  %v1927_v8 = vld [vmem:[#allocation2 + $0xa4] ss:$16 sps:$4 sm:$0xff]   ;;  %v1931_v10 = vld [vmem:[#allocation2 + $0xa0] ss:$16 sps:$4 sm:$0xff]   ;;  %924 = vmatprep.mubr.bf16.mxu1 %v2016_v51  ;;  %v2234_v5 = vld [vmem:[%s2475_s0 + $0x8] ss:$16 sps:$4 sm:$0xff]  }
  0x12   :  { %v1929_v9 = vld [vmem:[#allocation2 + $0x2a4] ss:$16 sps:$4 sm:$0xff]   ;;  %v1932_v11 = vld [vmem:[#allocation2 + $0x2a0] ss:$16 sps:$4 sm:$0xff]   ;;  %s2182_s26 = smov 127   ;;  %s2183_s27 = smov 1  }
  0x13   :  { %852 = vmatpush1.bf16.msra.mxu0 %v1925_v6  ;;  %v1933_v12 = vld [vmem:[#allocation2 + $0x84] ss:$16 sps:$4 sm:$0xff]   ;;  %v1937_v14 = vld [vmem:[#allocation2 + $0x80] ss:$16 sps:$4 sm:$0xff]   ;;  %v2017_v6 = vld [vmem:[#allocation2 + $0xe8] ss:$16 sps:$4 sm:$0xff]  }
  0x14   :  { %895 = vmatpush1.bf16.msra.mxu1 %v1926_v7  ;;  %853 = vmatprep.subr.bf16.mxu0 %v1927_v8  ;;  %v1935_v13 = vld [vmem:[#allocation2 + $0x284] ss:$16 sps:$4 sm:$0xff]   ;;  %v1938_v15 = vld [vmem:[#allocation2 + $0x280] ss:$16 sps:$4 sm:$0xff]   ;;  %v2020_v7 = vld [vmem:[#allocation2 + $0x2e8] ss:$16 sps:$4 sm:$0xff]  }
  0x15   :  { %896 = vmatprep.subr.bf16.mxu1 %v1929_v9  ;;  %v1939_v16 = vld [vmem:[#allocation2 + $0x64] ss:$16 sps:$4 sm:$0xff]   ;;  %v1943_v18 = vld [vmem:[#allocation2 + $0x60] ss:$16 sps:$4 sm:$0xff]   ;;  %v2025_v8 = vld [vmem:[#allocation2 + $0xcc] ss:$16 sps:$4 sm:$0xff]  }
  0x16   :  { %v1941_v17 = vld [vmem:[#allocation2 + $0x264] ss:$16 sps:$4 sm:$0xff]   ;;  %v1944_v19 = vld [vmem:[#allocation2 + $0x260] ss:$16 sps:$4 sm:$0xff]   ;;  %v2028_v9 = vld [vmem:[#allocation2 + $0x2cc] ss:$16 sps:$4 sm:$0xff]  }
  0x17   :  { %854 = vmatpush1.bf16.msra.mxu0 %v1931_v10  ;;  %v1945_v20 = vld [vmem:[#allocation2 + $0x44] ss:$16 sps:$4 sm:$0xff]   ;;  %v1949_v22 = vld [vmem:[#allocation2 + $0x40] ss:$16 sps:$4 sm:$0xff]   ;;  %v2023_v10 = vld [vmem:[#allocation2 + $0xc8] ss:$16 sps:$4 sm:$0xff]  }
  0x18   :  { %897 = vmatpush1.bf16.msra.mxu1 %v1932_v11  ;;  %855 = vmatprep.subr.bf16.mxu0 %v1933_v12  ;;  %v1947_v21 = vld [vmem:[#allocation2 + $0x244] ss:$16 sps:$4 sm:$0xff]   ;;  %v1950_v23 = vld [vmem:[#allocation2 + $0x240] ss:$16 sps:$4 sm:$0xff]   ;;  %v2026_v11 = vld [vmem:[#allocation2 + $0x2c8] ss:$16 sps:$4 sm:$0xff]  }
  0x19   :  { %898 = vmatprep.subr.bf16.mxu1 %v1935_v13  ;;  %v1951_v24 = vld [vmem:[#allocation2 + $0x24] ss:$16 sps:$4 sm:$0xff]   ;;  %v1955_v26 = vld [vmem:[#allocation2 + $0x20] ss:$16 sps:$4 sm:$0xff]   ;;  %v2031_v12 = vld [vmem:[#allocation2 + $0xac] ss:$16 sps:$4 sm:$0xff]  }
  0x1a   :  { %v1953_v25 = vld [vmem:[#allocation2 + $0x224] ss:$16 sps:$4 sm:$0xff]   ;;  %v1956_v27 = vld [vmem:[#allocation2 + $0x220] ss:$16 sps:$4 sm:$0xff]   ;;  %v2034_v13 = vld [vmem:[#allocation2 + $0x2ac] ss:$16 sps:$4 sm:$0xff]  }
  0x1b   :  { %856 = vmatpush1.bf16.msra.mxu0 %v1937_v14  ;;  %v1957_v28 = vld [vmem:[#allocation2 + $0x4] ss:$16 sps:$4 sm:$0xff]   ;;  %v1961_v30 = vld [vmem:[#allocation2] ss:$16 sps:$4 sm:$0xff]   ;;  %v2029_v14 = vld [vmem:[#allocation2 + $0xa8] ss:$16 sps:$4 sm:$0xff]  }
  0x1c   :  { %899 = vmatpush1.bf16.msra.mxu1 %v1938_v15  ;;  %857 = vmatprep.subr.bf16.mxu0 %v1939_v16  ;;  %v1959_v29 = vld [vmem:[#allocation2 + $0x204] ss:$16 sps:$4 sm:$0xff]   ;;  %v1962_v31 = vld [vmem:[#allocation2 + $0x200] ss:$16 sps:$4 sm:$0xff]   ;;  %v2032_v15 = vld [vmem:[#allocation2 + $0x2a8] ss:$16 sps:$4 sm:$0xff]  }
  0x1d   :  { %900 = vmatprep.subr.bf16.mxu1 %v1941_v17  ;;  %v1963_v32 = vld [vmem:[#allocation2 + $0x1e4] ss:$16 sps:$4 sm:$0xff]   ;;  %v1967_v34 = vld [vmem:[#allocation2 + $0x1e0] ss:$16 sps:$4 sm:$0xff]   ;;  %v2037_v16 = vld [vmem:[#allocation2 + $0x8c] ss:$16 sps:$4 sm:$0xff]  }
  0x1e   :  { %v1965_v33 = vld [vmem:[#allocation2 + $0x3e4] ss:$16 sps:$4 sm:$0xff]   ;;  %v1968_v35 = vld [vmem:[#allocation2 + $0x3e0] ss:$16 sps:$4 sm:$0xff]   ;;  %v2040_v17 = vld [vmem:[#allocation2 + $0x28c] ss:$16 sps:$4 sm:$0xff]  }
  0x1f   :  { %858 = vmatpush1.bf16.msra.mxu0 %v1943_v18  ;;  %v1969_v36 = vld [vmem:[#allocation2 + $0x1c4] ss:$16 sps:$4 sm:$0xff]   ;;  %v1973_v38 = vld [vmem:[#allocation2 + $0x1c0] ss:$16 sps:$4 sm:$0xff]   ;;  %v2035_v18 = vld [vmem:[#allocation2 + $0x88] ss:$16 sps:$4 sm:$0xff]  }
  0x20   :  { %901 = vmatpush1.bf16.msra.mxu1 %v1944_v19  ;;  %859 = vmatprep.subr.bf16.mxu0 %v1945_v20  ;;  %v1971_v37 = vld [vmem:[#allocation2 + $0x3c4] ss:$16 sps:$4 sm:$0xff]   ;;  %v1974_v39 = vld [vmem:[#allocation2 + $0x3c0] ss:$16 sps:$4 sm:$0xff]   ;;  %v2038_v19 = vld [vmem:[#allocation2 + $0x288] ss:$16 sps:$4 sm:$0xff]  }
  0x21   :  { %902 = vmatprep.subr.bf16.mxu1 %v1947_v21  ;;  %v1975_v40 = vld [vmem:[#allocation2 + $0x1a4] ss:$16 sps:$4 sm:$0xff]   ;;  %v1979_v42 = vld [vmem:[#allocation2 + $0x1a0] ss:$16 sps:$4 sm:$0xff]   ;;  %v2043_v20 = vld [vmem:[#allocation2 + $0x6c] ss:$16 sps:$4 sm:$0xff]  }
  0x22   :  { %v1977_v41 = vld [vmem:[#allocation2 + $0x3a4] ss:$16 sps:$4 sm:$0xff]   ;;  %v1980_v43 = vld [vmem:[#allocation2 + $0x3a0] ss:$16 sps:$4 sm:$0xff]   ;;  %v2046_v21 = vld [vmem:[#allocation2 + $0x26c] ss:$16 sps:$4 sm:$0xff]  }
  0x23   :  { %860 = vmatpush1.bf16.msra.mxu0 %v1949_v22  ;;  %v1981_v44 = vld [vmem:[#allocation2 + $0x184] ss:$16 sps:$4 sm:$0xff]   ;;  %v1985_v46 = vld [vmem:[#allocation2 + $0x180] ss:$16 sps:$4 sm:$0xff]   ;;  %v2041_v22 = vld [vmem:[#allocation2 + $0x68] ss:$16 sps:$4 sm:$0xff]  }
  0x24   :  { %903 = vmatpush1.bf16.msra.mxu1 %v1950_v23  ;;  %861 = vmatprep.subr.bf16.mxu0 %v1951_v24  ;;  %v1983_v45 = vld [vmem:[#allocation2 + $0x384] ss:$16 sps:$4 sm:$0xff]   ;;  %v1986_v47 = vld [vmem:[#allocation2 + $0x380] ss:$16 sps:$4 sm:$0xff]   ;;  %v2044_v23 = vld [vmem:[#allocation2 + $0x268] ss:$16 sps:$4 sm:$0xff]  }
  0x25   :  { %904 = vmatprep.subr.bf16.mxu1 %v1953_v25  ;;  %v1987_v48 = vld [vmem:[#allocation2 + $0x164] ss:$16 sps:$4 sm:$0xff]   ;;  %v1991_v52 = vld [vmem:[#allocation2 + $0x160] ss:$16 sps:$4 sm:$0xff]   ;;  %v2049_v24 = vld [vmem:[#allocation2 + $0x4c] ss:$16 sps:$4 sm:$0xff]  }
  0x26   :  { %v2013_v49 = vld [vmem:[%s2475_s0 + $0x4] ss:$16 sps:$4 sm:$0xff]   ;;  %v1992_v53 = vld [vmem:[#allocation2 + $0x360] ss:$16 sps:$4 sm:$0xff]   ;;  %v2052_v25 = vld [vmem:[#allocation2 + $0x24c] ss:$16 sps:$4 sm:$0xff]  }
  0x27   :  { %862 = vmatpush1.bf16.msra.mxu0 %v1955_v26  ;;  %v1989_v50 = vld [vmem:[#allocation2 + $0x364] ss:$16 sps:$4 sm:$0xff]   ;;  %881 = vmatprep.mubr.bf16.mxu0 %v2013_v49  ;;  %v1997_v56 = vld [vmem:[#allocation2 + $0x140] ss:$16 sps:$4 sm:$0xff]   ;;  %v2047_v26 = vld [vmem:[#allocation2 + $0x48] ss:$16 sps:$4 sm:$0xff]  }
  0x28   :  { %905 = vmatpush1.bf16.msra.mxu1 %v1956_v27  ;;  %863 = vmatprep.subr.bf16.mxu0 %v1957_v28  ;;  %v1993_v54 = vld [vmem:[#allocation2 + $0x144] ss:$16 sps:$4 sm:$0xff]   ;;  %v1998_v57 = vld [vmem:[#allocation2 + $0x340] ss:$16 sps:$4 sm:$0xff]   ;;  %v2050_v27 = vld [vmem:[#allocation2 + $0x248] ss:$16 sps:$4 sm:$0xff]  }
  0x29   :  { %906 = vmatprep.subr.bf16.mxu1 %v1959_v29  ;;  %v1995_v55 = vld [vmem:[#allocation2 + $0x344] ss:$16 sps:$4 sm:$0xff]   ;;  %v2003_v60 = vld [vmem:[#allocation2 + $0x120] ss:$16 sps:$4 sm:$0xff]   ;;  %v2055_v28 = vld [vmem:[#allocation2 + $0x2c] ss:$16 sps:$4 sm:$0xff]  }
  0x2a   :  { %v1999_v58 = vld [vmem:[#allocation2 + $0x124] ss:$16 sps:$4 sm:$0xff]   ;;  %v2004_v61 = vld [vmem:[#allocation2 + $0x320] ss:$16 sps:$4 sm:$0xff]   ;;  %v2058_v29 = vld [vmem:[#allocation2 + $0x22c] ss:$16 sps:$4 sm:$0xff]  }
  0x2b   :  { %864 = vmatpush1.bf16.msra.mxu0 %v1961_v30  ;;  %v2001_v59 = vld [vmem:[#allocation2 + $0x324] ss:$16 sps:$4 sm:$0xff]   ;;  %v2009_v0 = vld [vmem:[#allocation2 + $0x100] ss:$16 sps:$4 sm:$0xff]   ;;  %v2053_v30 = vld [vmem:[#allocation2 + $0x28] ss:$16 sps:$4 sm:$0xff]  }
  0x2c   :  { %907 = vmatpush1.bf16.msra.mxu1 %v1962_v31  ;;  %865 = vmatprep.subr.bf16.mxu0 %v1963_v32  ;;  %v2005_v62 = vld [vmem:[#allocation2 + $0x104] ss:$16 sps:$4 sm:$0xff]   ;;  %v2010_v1 = vld [vmem:[#allocation2 + $0x300] ss:$16 sps:$4 sm:$0xff]   ;;  %v2056_v31 = vld [vmem:[#allocation2 + $0x228] ss:$16 sps:$4 sm:$0xff]  }
  0x2d   :  { %908 = vmatprep.subr.bf16.mxu1 %v1965_v33  ;;  %v2007_v63 = vld [vmem:[#allocation2 + $0x304] ss:$16 sps:$4 sm:$0xff]   ;;  %v2229_v4 = vld [vmem:[%s2475_s0] ss:$16 sps:$4 sm:$0xff]   ;;  %v2061_v32 = vld [vmem:[#allocation2 + $0xc] ss:$16 sps:$4 sm:$0xff]  }
  0x2e   :  { %v2064_v33 = vld [vmem:[#allocation2 + $0x20c] ss:$16 sps:$4 sm:$0xff]   ;;  %vm2185_vm2 = vmmov 0   ;;  %vm1468_vm3 = vcmask 261120  }
  0x2f   :  { %866 = vmatpush2.bf16.msra.mxu0 %v1967_v34  ;;  %v2059_v34 = vld [vmem:[#allocation2 + $0x8] ss:$16 sps:$4 sm:$0xff]  }
  0x30   :  { %909 = vmatpush2.bf16.msra.mxu1 %v1968_v35  ;;  %867 = vmatprep.subr.bf16.mxu0 %v1969_v36  ;;  %v2062_v35 = vld [vmem:[#allocation2 + $0x208] ss:$16 sps:$4 sm:$0xff]   ;;  %v2067_v36 = vld [vmem:[#allocation2 + $0x1ec] ss:$16 sps:$4 sm:$0xff]  }
  0x31   :  { %910 = vmatprep.subr.bf16.mxu1 %v1971_v37  ;;  %v2070_v37 = vld [vmem:[#allocation2 + $0x3ec] ss:$16 sps:$4 sm:$0xff]  }
  0x33   :  { %868 = vmatpush2.bf16.msra.mxu0 %v1973_v38  ;;  %v2065_v38 = vld [vmem:[#allocation2 + $0x1e8] ss:$16 sps:$4 sm:$0xff]  }
  0x34   :  { %911 = vmatpush2.bf16.msra.mxu1 %v1974_v39  ;;  %869 = vmatprep.subr.bf16.mxu0 %v1975_v40  ;;  %v2068_v39 = vld [vmem:[#allocation2 + $0x3e8] ss:$16 sps:$4 sm:$0xff]   ;;  %v2073_v40 = vld [vmem:[#allocation2 + $0x1cc] ss:$16 sps:$4 sm:$0xff]  }
  0x35   :  { %912 = vmatprep.subr.bf16.mxu1 %v1977_v41  ;;  %v2076_v41 = vld [vmem:[#allocation2 + $0x3cc] ss:$16 sps:$4 sm:$0xff]  }
  0x37   :  { %870 = vmatpush2.bf16.msra.mxu0 %v1979_v42  ;;  %v2071_v42 = vld [vmem:[#allocation2 + $0x1c8] ss:$16 sps:$4 sm:$0xff]  }
  0x38   :  { %913 = vmatpush2.bf16.msra.mxu1 %v1980_v43  ;;  %871 = vmatprep.subr.bf16.mxu0 %v1981_v44  ;;  %v2074_v43 = vld [vmem:[#allocation2 + $0x3c8] ss:$16 sps:$4 sm:$0xff]   ;;  %v2079_v44 = vld [vmem:[#allocation2 + $0x1ac] ss:$16 sps:$4 sm:$0xff]  }
  0x39   :  { %914 = vmatprep.subr.bf16.mxu1 %v1983_v45  ;;  %v2082_v45 = vld [vmem:[#allocation2 + $0x3ac] ss:$16 sps:$4 sm:$0xff]  }
  0x3b   :  { %872 = vmatpush2.bf16.msra.mxu0 %v1985_v46  ;;  %v2077_v46 = vld [vmem:[#allocation2 + $0x1a8] ss:$16 sps:$4 sm:$0xff]  }
  0x3c   :  { %915 = vmatpush2.bf16.msra.mxu1 %v1986_v47  ;;  %873 = vmatprep.subr.bf16.mxu0 %v1987_v48  ;;  %v2080_v47 = vld [vmem:[#allocation2 + $0x3a8] ss:$16 sps:$4 sm:$0xff]   ;;  %v2085_v48 = vld [vmem:[#allocation2 + $0x18c] ss:$16 sps:$4 sm:$0xff]  }
  0x3d   :  { %916 = vmatprep.subr.bf16.mxu1 %v1989_v50  ;;  %v2083_v50 = vld [vmem:[#allocation2 + $0x188] ss:$16 sps:$4 sm:$0xff]  }
  0x3f   :  { %874 = vmatpush2.bf16.msra.mxu0 %v1991_v52  ;;  %v2091_v52 = vld [vmem:[#allocation2 + $0x16c] ss:$16 sps:$4 sm:$0xff]  }
  0x40   :  { %917 = vmatpush2.bf16.msra.mxu1 %v1992_v53  ;;  %875 = vmatprep.subr.bf16.mxu0 %v1993_v54  ;;  %v2094_v53 = vld [vmem:[#allocation2 + $0x36c] ss:$16 sps:$4 sm:$0xff]   ;;  %v2089_v54 = vld [vmem:[#allocation2 + $0x168] ss:$16 sps:$4 sm:$0xff]  }
  0x41   :  { %918 = vmatprep.subr.bf16.mxu1 %v1995_v55  ;;  %v2092_v55 = vld [vmem:[#allocation2 + $0x368] ss:$16 sps:$4 sm:$0xff]  }
  0x43   :  { %876 = vmatpush2.bf16.msra.mxu0 %v1997_v56  ;;  %v2097_v56 = vld [vmem:[#allocation2 + $0x14c] ss:$16 sps:$4 sm:$0xff]  }
  0x44   :  { %919 = vmatpush2.bf16.msra.mxu1 %v1998_v57  ;;  %877 = vmatprep.subr.bf16.mxu0 %v1999_v58  ;;  %v2100_v57 = vld [vmem:[#allocation2 + $0x34c] ss:$16 sps:$4 sm:$0xff]   ;;  %v2095_v58 = vld [vmem:[#allocation2 + $0x148] ss:$16 sps:$4 sm:$0xff]  }
  0x45   :  { %920 = vmatprep.subr.bf16.mxu1 %v2001_v59  ;;  %v2098_v59 = vld [vmem:[#allocation2 + $0x348] ss:$16 sps:$4 sm:$0xff]  }
  0x47   :  { %878 = vmatpush2.bf16.msra.mxu0 %v2003_v60  ;;  %v2103_v60 = vld [vmem:[#allocation2 + $0x12c] ss:$16 sps:$4 sm:$0xff]  }
  0x48   :  { %921 = vmatpush2.bf16.msra.mxu1 %v2004_v61  ;;  %879 = vmatprep.subr.bf16.mxu0 %v2005_v62  ;;  %v2106_v61 = vld [vmem:[#allocation2 + $0x32c] ss:$16 sps:$4 sm:$0xff]   ;;  %v2101_v62 = vld [vmem:[#allocation2 + $0x128] ss:$16 sps:$4 sm:$0xff]  }
  0x49   :  { %922 = vmatprep.subr.bf16.mxu1 %v2007_v63  ;;  %v2104_v63 = vld [vmem:[#allocation2 + $0x328] ss:$16 sps:$4 sm:$0xff]  }
  0x4b   :  { %880 = vmatpush2.bf16.msra.mxu0 %v2009_v0  ;;  %v2109_v0 = vld [vmem:[#allocation2 + $0x10c] ss:$16 sps:$4 sm:$0xff]  }
  0x4c   :  { %923 = vmatpush2.bf16.msra.mxu1 %v2010_v1  ;;  %935 = vmatprep.subr.bf16.mxu0 %v2019_v2  ;;  %v2112_v1 = vld [vmem:[#allocation2 + $0x30c] ss:$16 sps:$4 sm:$0xff]   ;;  %v2107_v2 = vld [vmem:[#allocation2 + $0x108] ss:$16 sps:$4 sm:$0xff]  }
  0x4d   :  { %978 = vmatprep.subr.bf16.mxu1 %v2022_v3  ;;  %v2110_v3 = vld [vmem:[#allocation2 + $0x308] ss:$16 sps:$4 sm:$0xff]  }
  0x4e   :  { %882 = vmatmul.mubr.bf16.vlgmr.msra.gmra.mxu0 %v2229_v4 }
  0x4f   :  { %925 = vmatmul.mubr.bf16.vlgmr.msra.gmra.mxu1 %v2234_v5  ;;  %936 = vmatpush1.bf16.msra.mxu0 %v2017_v6  ;;  %v169_v6 = vlaneseq }
  0x50   :  { %979 = vmatpush1.bf16.msra.mxu1 %v2020_v7  ;;  %937 = vmatprep.subr.bf16.mxu0 %v2025_v8 }
  0x51   :  { %980 = vmatprep.subr.bf16.mxu1 %v2028_v9  ;;  %967 = vmatprep.mubr.bf16.mxu0 %v2013_v49  ;;  %v2088_v49 = vld [vmem:[#allocation2 + $0x38c] ss:$16 sps:$4 sm:$0xff]   ;;  %v2241_v7 = vshrl.u32 %v169_v6, 7  ;;  %v2247_v9 = vld [vmem:[%s2477_s2] sm:$0xf] }
  0x52   :  { %1010 = vmatprep.mubr.bf16.mxu1 %v2016_v51  ;;  %v2086_v51 = vld [vmem:[#allocation2 + $0x388] ss:$16 sps:$4 sm:$0xff]  }
  0x53   :  { %938 = vmatpush1.bf16.msra.mxu0 %v2023_v10  ;;  %v171_v8 = vsub.s32 0, %v2241_v7 }
  0x54   :  { %981 = vmatpush1.bf16.msra.mxu1 %v2026_v11  ;;  %939 = vmatprep.subr.bf16.mxu0 %v2031_v12  ;;  %v175_v11 = vsub.s32 1, %v2241_v7 }
  0x55   :  { %982 = vmatprep.subr.bf16.mxu1 %v2034_v13  ;;  %v172_v10 = vrot.slane %v2247_v9, %v171_v8 }
  0x56   :  { %v176_v13 = vrot.slane %v2247_v9, %v175_v11 }
  0x57   :  { %940 = vmatpush1.bf16.msra.mxu0 %v2029_v14 }
  0x58   :  { %983 = vmatpush1.bf16.msra.mxu1 %v2032_v15  ;;  %941 = vmatprep.subr.bf16.mxu0 %v2037_v16 }
  0x59   :  { %984 = vmatprep.subr.bf16.mxu1 %v2040_v17 }
  0x5b   :  { %942 = vmatpush1.bf16.msra.mxu0 %v2035_v18 }
  0x5c   :  { %985 = vmatpush1.bf16.msra.mxu1 %v2038_v19  ;;  %943 = vmatprep.subr.bf16.mxu0 %v2043_v20 }
  0x5d   :  { %986 = vmatprep.subr.bf16.mxu1 %v2046_v21 }
  0x5f   :  { %944 = vmatpush1.bf16.msra.mxu0 %v2041_v22  ;;  %v2113_v22 = vld [vmem:[%s2478_s3 + $0x78] sm:$0xff]  }
  0x60   :  { %987 = vmatpush1.bf16.msra.mxu1 %v2044_v23  ;;  %945 = vmatprep.subr.bf16.mxu0 %v2049_v24  ;;  %v2114_v23 = vld [vmem:[%s2478_s3 + $0x38] sm:$0xff]   ;;  %v2115_v24 = vld [vmem:[%s2478_s3 + $0x70] sm:$0xff]  }
  0x61   :  { %988 = vmatprep.subr.bf16.mxu1 %v2052_v25 }
  0x63   :  { %946 = vmatpush1.bf16.msra.mxu0 %v2047_v26 }
  0x64   :  { %989 = vmatpush1.bf16.msra.mxu1 %v2050_v27  ;;  %947 = vmatprep.subr.bf16.mxu0 %v2055_v28  ;;  %v2117_v27 = vld [vmem:[%s2478_s3 + $0xf8] sm:$0xff]  }
  0x65   :  { %990 = vmatprep.subr.bf16.mxu1 %v2058_v29  ;;  %v2118_v28 = vld [vmem:[%s2478_s3 + $0xb8] sm:$0xff]  }
  0x67   :  { %948 = vmatpush1.bf16.msra.mxu0 %v2053_v30  ;;  %v2121_v30 = vld [vmem:[%s2478_s3 + $0xf0] sm:$0xff]  }
  0x68   :  { %991 = vmatpush1.bf16.msra.mxu1 %v2056_v31  ;;  %949 = vmatprep.subr.bf16.mxu0 %v2061_v32 }
  0x69   :  { %992 = vmatprep.subr.bf16.mxu1 %v2064_v33 }
  0x6b   :  { %950 = vmatpush1.bf16.msra.mxu0 %v2059_v34 }
  0x6c   :  { %993 = vmatpush1.bf16.msra.mxu1 %v2062_v35  ;;  %951 = vmatprep.subr.bf16.mxu0 %v2067_v36  ;;  %v2116_v35 = vld [vmem:[%s2478_s3 + $0x30] sm:$0xff]  }
  0x6d   :  { %994 = vmatprep.subr.bf16.mxu1 %v2070_v37  ;;  %v2122_v36 = vld [vmem:[%s2478_s3 + $0xb0] sm:$0xff]  }
  0x6f   :  { %952 = vmatpush2.bf16.msra.mxu0 %v2065_v38 }
  0x70   :  { %995 = vmatpush2.bf16.msra.mxu1 %v2068_v39  ;;  %953 = vmatprep.subr.bf16.mxu0 %v2073_v40  ;;  %v2119_v39 = vld [vmem:[%s2478_s3 + $0x68] sm:$0xff]  }
  0x71   :  { %996 = vmatprep.subr.bf16.mxu1 %v2076_v41  ;;  %v2125_v40 = vld [vmem:[%s2478_s3 + $0xe8] sm:$0xff]  }
  0x73   :  { %954 = vmatpush2.bf16.msra.mxu0 %v2071_v42  ;;  %v2120_v42 = vld [vmem:[%s2478_s3 + $0x28] sm:$0xff]  }
  0x74   :  { %997 = vmatpush2.bf16.msra.mxu1 %v2074_v43  ;;  %955 = vmatprep.subr.bf16.mxu0 %v2079_v44  ;;  %v2126_v43 = vld [vmem:[%s2478_s3 + $0xa8] sm:$0xff]  }
  0x75   :  { %998 = vmatprep.subr.bf16.mxu1 %v2082_v45  ;;  %v2123_v45 = vld [vmem:[%s2478_s3 + $0x60] sm:$0xff]  }
  0x77   :  { %956 = vmatpush2.bf16.msra.mxu0 %v2077_v46  ;;  %v2129_v46 = vld [vmem:[%s2478_s3 + $0xe0] sm:$0xff]  }
  0x78   :  { %999 = vmatpush2.bf16.msra.mxu1 %v2080_v47  ;;  %957 = vmatprep.subr.bf16.mxu0 %v2085_v48  ;;  %v2124_v47 = vld [vmem:[%s2478_s3 + $0x20] sm:$0xff]  }
  0x79   :  { %1000 = vmatprep.subr.bf16.mxu1 %v2088_v49  ;;  %v2130_v48 = vld [vmem:[%s2478_s3 + $0xa0] sm:$0xff]   ;;  %v2127_v49 = vld [vmem:[%s2478_s3 + $0x58] sm:$0xff]  }
  0x7b   :  { %958 = vmatpush2.bf16.msra.mxu0 %v2083_v50  ;;  %v2128_v50 = vld [vmem:[%s2478_s3 + $0x18] sm:$0xff]  }
  0x7c   :  { %1001 = vmatpush2.bf16.msra.mxu1 %v2086_v51  ;;  %959 = vmatprep.subr.bf16.mxu0 %v2091_v52  ;;  %v2131_v51 = vld [vmem:[%s2478_s3 + $0x50] sm:$0xff]   ;;  %v179_v52 = vsub.s32 2, %v2241_v7 }
  0x7d   :  { %1002 = vmatprep.subr.bf16.mxu1 %v2094_v53  ;;  %v183_v53 = vsub.s32 3, %v2241_v7 }
  0x7f   :  { %960 = vmatpush2.bf16.msra.mxu0 %v2089_v54  ;;  %v180_v54 = vrot.slane %v2247_v9, %v179_v52 }
  0x80   :  { %1003 = vmatpush2.bf16.msra.mxu1 %v2092_v55  ;;  %961 = vmatprep.subr.bf16.mxu0 %v2097_v56  ;;  %v2132_v55 = vld [vmem:[%s2478_s3 + $0x10] sm:$0xff]   ;;  %v2133_v56 = vld [vmem:[%s2478_s3 + $0xd8] sm:$0xff]  }
  0x81   :  { %1004 = vmatprep.subr.bf16.mxu1 %v2100_v57  ;;  %v184_v57 = vrot.slane %v2247_v9, %v183_v53  ;;  %v2138_v9 = vld [vmem:[%s2478_s3 + $0x90] sm:$0xff]  }
  0x83   :  { %962 = vmatpush2.bf16.msra.mxu0 %v2095_v58  ;;  %v2134_v58 = vld [vmem:[%s2478_s3 + $0x98] sm:$0xff]  }
  0x84   :  { %1005 = vmatpush2.bf16.msra.mxu1 %v2098_v59  ;;  %963 = vmatprep.subr.bf16.mxu0 %v2103_v60 }
  0x85   :  { %1006 = vmatprep.subr.bf16.mxu1 %v2106_v61 }
  0x87   :  { %964 = vmatpush2.bf16.msra.mxu0 %v2101_v62  ;;  %v2135_v62 = vld [vmem:[%s2478_s3 + $0x48] sm:$0xff]  }
  0x88   :  { %1007 = vmatpush2.bf16.msra.mxu1 %v2104_v63  ;;  %965 = vmatprep.subr.bf16.mxu0 %v2109_v0 }
  0x89   :  { %1008 = vmatprep.subr.bf16.mxu1 %v2112_v1  ;;  %v2136_v1 = vld [vmem:[%s2478_s3 + $0x8] sm:$0xff]  }
  0x8b   :  { %966 = vmatpush2.bf16.msra.mxu0 %v2107_v2  ;;  %v2137_v2 = vld [vmem:[%s2478_s3 + $0xd0] sm:$0xff]  }
  0x8c   :  { %1009 = vmatpush2.bf16.msra.mxu1 %v2110_v3  ;;  %1799 = vmatprep.subr.bf16.mxu0 %v2113_v22  ;;  %v2142_v22 = vld [vmem:[%s2478_s3 + $0x88] sm:$0xff]  }
  0x8d   :  { %1821 = vmatprep.subr.bf16.mxu1 %v2117_v27 }
  0x8e   :  { %968 = vmatmul.mubr.bf16.vlgmr.msra.gmra.mxu0 %v2229_v4 }
  0x8f   :  { %1011 = vmatmul.mubr.bf16.vlgmr.msra.gmra.mxu1 %v2234_v5  ;;  %1800 = vmatpush3.bf16.msra.mxu0 %v2114_v23 }
  0x90   :  { %1801 = vmatprep.subr.bf16.mxu0 %v2115_v24  ;;  %1822 = vmatpush3.bf16.msra.mxu1 %v2118_v28 }
  0x91   :  { %1823 = vmatprep.subr.bf16.mxu1 %v2121_v30  ;;  %v2143_v30 = vld [vmem:[%s2478_s3 + $0xc0] sm:$0xff]  }
  0x93   :  { %1802 = vmatpush3.bf16.msra.mxu0 %v2116_v35 }
  0x94   :  { %1824 = vmatpush3.bf16.msra.mxu1 %v2122_v36  ;;  %1803 = vmatprep.subr.bf16.mxu0 %v2119_v39  ;;  %v2144_v36 = vld [vmem:[%s2478_s3 + $0x80] sm:$0xff]  }
  0x95   :  { %1825 = vmatprep.subr.bf16.mxu1 %v2125_v40  ;;  %v1046_v40 = vand.u32 127, %v169_v6 }
  0x97   :  { %1804 = vmatpush3.bf16.msra.mxu0 %v2120_v42  ;;  %vm1047_vm0 = vcmp.lt.s32.totalorder %v1046_v40, 1  ;;  %vm1072_vm1 = vcmp.lt.s32.totalorder %v1046_v40, 127 }
  0x98   :  { %1826 = vmatpush3.bf16.msra.mxu1 %v2126_v43  ;;  %1805 = vmatprep.subr.bf16.mxu0 %v2123_v45 }
  0x99   :  { %1827 = vmatprep.subr.bf16.mxu1 %v2129_v46 }
  0x9b   :  { %1806 = vmatpush3.bf16.msra.mxu0 %v2124_v47 }
  0x9c   :  { %1828 = vmatpush3.bf16.msra.mxu1 %v2130_v48  ;;  %1807 = vmatprep.subr.bf16.mxu0 %v2127_v49 }
  0x9d   :  { %1829 = vmatprep.subr.bf16.mxu1 %v2133_v56 }
  0x9f   :  { %1808 = vmatpush3.bf16.msra.mxu0 %v2128_v50 }
  0xa0   :  { %1809 = vmatprep.subr.bf16.mxu0 %v2131_v51  ;;  %1830 = vmatpush3.bf16.msra.mxu1 %v2134_v58 }
  0xa1   :  { %1831 = vmatprep.subr.bf16.mxu1 %v2137_v2 }
  0xa3   :  { %1810 = vmatpush3.bf16.msra.mxu0 %v2132_v55 }
  0xa4   :  { %1811 = vmatprep.subr.bf16.mxu0 %v2135_v62  ;;  %1832 = vmatpush3.bf16.msra.mxu1 %v2138_v9 }
  0xa7   :  { %1812 = vmatpush3.bf16.msra.mxu0 %v2136_v1 }
 0x10e   :  { %v883_v4 = vpop.f32.mrf.mxu0 }
 0x10f   :  { %v926_v12 = vpop.f32.mrf.mxu1  ;;  %v884_v5 = vadd.f32 %v883_v4, %v172_v10 }
 0x110   :  { %v885_v14 = vpop.f32.mrf.mxu0 }
 0x111   :  { %v928_v15 = vpop.f32.mrf.mxu1  ;;  %v2256_v18 = vadd.f32 %v926_v12, %v884_v5  ;;  %v886_v19 = vadd.f32 %v885_v14, %v176_v13  ;;  %v2139_v14 = vld [vmem:[%s2478_s3 + $0x40] sm:$0xff]  }
 0x112   :  { %v887_v16 = vpop.f32.mrf.mxu0  ;;  %1813 = vmatprep.subr.bf16.mxu0 %v2139_v14 }
 0x113   :  { %v930_v17 = vpop.f32.mrf.mxu1  ;;  %v888_v20 = vadd.f32 %v887_v16, %v172_v10  ;;  %v1021_v31 = vmax.f32 %v2256_v18, 0.0  ;;  %v2279_v32 = vadd.f32 %v928_v15, %v886_v19  ;;  %v2140_v19 = vld [vmem:[%s2478_s3] sm:$0xff]  }
 0x114   :  { %v889_v21 = vpop.f32.mrf.mxu0  ;;  %1814 = vmatpush3.bf16.msra.mxu0 %v2140_v19 }
 0x115   :  { %v2267_v25 = vadd.f32 %v930_v17, %v888_v20  ;;  %v890_v26 = vadd.f32 %v889_v21, %v176_v13  ;;  %v932_v29 = vpop.f32.mrf.mxu1  ;;  %v1022_v41 = vmax.f32 %v2279_v32, 0.0  ;;  %v2141_v20 = vld [vmem:[%s2478_s3 + $0xc8] sm:$0xff]  }
 0x116   :  { %1833 = vmatprep.subr.bf16.mxu1 %v2141_v20 }
 0x117   :  { %v1025_v33 = vmax.f32 %v2267_v25, 0.0  ;;  %v2282_v34 = vadd.f32 %v932_v29, %v890_v26  ;;  %1834 = vmatpush3.bf16.msra.mxu1 %v2142_v22 }
 0x118   :  { %1835 = vmatprep.subr.bf16.mxu1 %v2143_v30 }
 0x119   :  { %v1026_v37 = vmax.f32 %v2282_v34, 0.0  ;;  %v1878_v38 = vpack.i.bf16 %v1025_v33, %v1021_v31 }
 0x11b   :  { %1879 = vrot.lane.b32.xlu1 %v1878_v38, %s2182_s26  ;;  %1874 = vrot.lane.b32.xlu0 %v1878_v38, %s2183_s27  ;;  %v1888_v44 = vpack.i.bf16 %v1026_v37, %v1022_v41 }
 0x11c   :  { %1836 = vmatpush3.bf16.msra.mxu1 %v2144_v36 }
 0x11f   :  { %1889 = vrot.lane.b32.xlu1 %v1888_v44, %s2182_s26  ;;  %1884 = vrot.lane.b32.xlu0 %v1888_v44, %s2183_s27 }
 0x14e   :  { %v969_v59 = vpop.f32.mrf.mxu0 }
 0x14f   :  { %v1012_v60 = vpop.f32.mrf.mxu1  ;;  %v970_v61 = vadd.f32 %v969_v59, %v180_v54 }
 0x150   :  { %v971_v63 = vpop.f32.mrf.mxu0 }
 0x151   :  { %v1014_v0 = vpop.f32.mrf.mxu1  ;;  %v972_v3 = vadd.f32 %v971_v63, %v184_v57  ;;  %v2366_v12 = vadd.f32 %v1012_v60, %v970_v61 }
 0x152   :  { %v973_v10 = vpop.f32.mrf.mxu0 }
 0x153   :  { %v1016_v4 = vpop.f32.mrf.mxu1  ;;  %v974_v5 = vadd.f32 %v973_v10, %v180_v54  ;;  %v2371_v15 = vadd.f32 %v1014_v0, %v972_v3  ;;  %v1023_v23 = vmax.f32 %v2366_v12, 0.0  ;;  %v2184_v12 = vmov 0.0  }
 0x154   :  { %v975_v13 = vpop.f32.mrf.mxu0  ;;  %1849 = vmatprep.subr.bf16.mxu0 %v2184_v12  ;;  %1857 = vmatprep.subr.bf16.mxu1 %v2184_v12 }
 0x155   :  { %v2373_v16 = vadd.f32 %v1016_v4, %v974_v5  ;;  %v976_v17 = vadd.f32 %v975_v13, %v184_v57  ;;  %v1018_v21 = vpop.f32.mrf.mxu1  ;;  %v1024_v27 = vmax.f32 %v2371_v15, 0.0  ;;  %v2146_v15 = vld [vmem:[%s2479_s4] sm:$0xff]  }
 0x157   :  { %v1027_v24 = vmax.f32 %v2373_v16, 0.0  ;;  %v2386_v26 = vadd.f32 %v1018_v21, %v976_v17  ;;  %v1165_v16 = vld [vmem:[%s2479_s4 + $0x20] sm:$0xf] }
 0x159   :  { %v1028_v28 = vmax.f32 %v2386_v26, 0.0  ;;  %v1893_v29 = vpack.i.bf16 %v1027_v24, %v1023_v23 }
 0x15b   :  { %1894 = vrot.lane.b32.xlu1 %v1893_v29, %s2182_s26  ;;  %v1898_v35 = vpack.i.bf16 %v1028_v28, %v1024_v27 }
 0x15d   :  { %1899 = vrot.lane.b32.xlu0 %v1898_v35, %s2183_s27 }
 0x15f   :  { %1909 = vrot.lane.b32.xlu1 %v1898_v35, %s2182_s26 }
 0x161   :  { %1904 = vrot.lane.b32.xlu0 %v1893_v29, %s2183_s27 }
 0x18d   :  { %v1875_v38 = vpop.permute.xlu0 %1874  ;;  %v1880_v39 = vpop.permute.xlu1 %1879 }
 0x18e   :  { %v1877_v46 = vunpack.i.h.bf16 %v1875_v38  ;;  %v1876_v47 = vunpack.i.l.bf16 %v1875_v38  ;;  %v1882_v55 = vunpack.i.h.bf16 %v1880_v39  ;;  %v1881_v56 = vunpack.i.l.bf16 %v1880_v39 }
 0x191   :  { %v1885_v42 = vpop.permute.xlu0 %1884  ;;  %v1890_v43 = vpop.permute.xlu1 %1889 }
 0x192   :  { %v1887_v44 = vunpack.i.h.bf16 %v1885_v42  ;;  %v1886_v45 = vunpack.i.l.bf16 %v1885_v42  ;;  %v1892_v48 = vunpack.i.h.bf16 %v1890_v43  ;;  %v1891_v49 = vunpack.i.l.bf16 %v1890_v43 }
 0x194   :  { %v1052_v57 = vsel %vm1047_vm0, %v1876_v47, %v1886_v45  ;;  %v1053_v58 = vsel %vm1047_vm0, %v1877_v46, %v1887_v44  ;;  %v1077_v63 = vsel %vm1072_vm1, %v1881_v56, %v1891_v49  ;;  %v1078_v0 = vsel %vm1072_vm1, %v1882_v55, %v1892_v48 }
 0x1cd   :  { %v1895_v50 = vpop.permute.xlu1 %1894 }
 0x1ce   :  { %v1897_v51 = vunpack.i.h.bf16 %v1895_v50  ;;  %v1896_v54 = vunpack.i.l.bf16 %v1895_v50 }
 0x1cf   :  { %v1900_v6 = vpop.permute.xlu0 %1899 }
 0x1d0   :  { %v1075_v59 = vsel %vm1072_vm1, %v1891_v49, %v1896_v54  ;;  %v1076_v60 = vsel %vm1072_vm1, %v1892_v48, %v1897_v51  ;;  %v1902_v61 = vunpack.i.h.bf16 %v1900_v6  ;;  %v1901_v62 = vunpack.i.l.bf16 %v1900_v6  ;;  %v2145_v49 = vld [vmem:[%s2479_s4 + $0x8] sm:$0xff]  }
 0x1d1   :  { %v1082_v1 = vmax.f32 %v1052_v57, %v1075_v59  ;;  %v1086_v2 = vmax.f32 %v1053_v58, %v1076_v60  ;;  %v1910_v3 = vpop.permute.xlu1 %1909 }
 0x1d2   :  { %v1054_v9 = vsel %vm1047_vm0, %v1901_v62, %v1876_v47  ;;  %v1055_v10 = vsel %vm1047_vm0, %v1902_v61, %v1877_v46  ;;  %v1912_v4 = vunpack.i.h.bf16 %v1910_v3  ;;  %v1911_v5 = vunpack.i.l.bf16 %v1910_v3  ;;  %v2148_v3 = vld [vmem:[%s2479_s4 + $0x10] sm:$0xff]  }
 0x1d3   :  { %v1081_v13 = vmax.f32 %v1054_v9, %v1077_v63  ;;  %v1085_v14 = vmax.f32 %v1055_v10, %v1078_v0  ;;  %v1905_v17 = vpop.permute.xlu0 %1904  ;;  %v1090_v19 = vmax.f32 %v1022_v41, %v1082_v1  ;;  %v1094_v20 = vmax.f32 %v1026_v37, %v1086_v2 }
 0x1d4   :  { %v1073_v21 = vsel %vm1072_vm1, %v1896_v54, %v1911_v5  ;;  %v1907_v30 = vunpack.i.h.bf16 %v1905_v17  ;;  %v1906_v35 = vunpack.i.l.bf16 %v1905_v17  ;;  %v1074_v36 = vsel %vm1072_vm1, %v1897_v51, %v1912_v4 }
 0x1d5   :  { %v1089_v22 = vmax.f32 %v1021_v31, %v1081_v13  ;;  %v1093_v29 = vmax.f32 %v1025_v33, %v1085_v14  ;;  %v1079_v38 = vsel %vm1072_vm1, %v1911_v5, %v1881_v56  ;;  %v1080_v32 = vsel %vm1072_vm1, %v1912_v4, %v1882_v55 }
 0x1d6   :  { %v1098_v41 = vpack.c.bf16 %v1094_v20, %v1090_v19  ;;  %v1048_v34 = vsel %vm1047_vm0, %v1906_v35, %v1901_v62  ;;  %v1049_v37 = vsel %vm1047_vm0, %v1907_v30, %v1902_v61  ;;  %v1050_v39 = vsel %vm1047_vm0, %v1886_v45, %v1906_v35 }
 0x1d7   :  { %v1051_v18 = vsel %vm1047_vm0, %v1887_v44, %v1907_v30  ;;  %v1083_v31 = vmax.f32 %v1050_v39, %v1073_v21  ;;  %v1084_v25 = vmax.f32 %v1048_v34, %v1079_v38  ;;  %v1088_v42 = vmax.f32 %v1049_v37, %v1080_v32 }
 0x1d8   :  { %v1087_v33 = vmax.f32 %v1051_v18, %v1074_v36  ;;  %1395 = vmatprep.mubr.bf16.mxu0 %v1098_v41  ;;  %v1097_v43 = vpack.c.bf16 %v1093_v29, %v1089_v22 }
 0x1d9   :  { %v1091_v46 = vmax.f32 %v1023_v23, %v1083_v31  ;;  %v1092_v48 = vmax.f32 %v1024_v27, %v1084_v25  ;;  %v1096_v45 = vmax.f32 %v1028_v28, %v1088_v42  ;;  %v1596_v25 = vsub.s32 4, %v2241_v7 }
 0x1da   :  { %v1095_v47 = vmax.f32 %v1027_v24, %v1087_v33  ;;  %1396 = vmatmul.mubr.bf16.vlgmr.msra.gmra.mxu0 %v1097_v43  ;;  %v1166_v24 = vunpack.c.l.bf16 %v1165_v16 }
 0x1db   :  { %v1100_v40 = vpack.c.bf16 %v1096_v45, %v1092_v48  ;;  %1850 = vmatpush3.bf16.msra.mxu0 %v2145_v49  ;;  %1853 = vmatprep.mubr.msk.bf16.mxu0 %vm2185_vm2, %v2184_v12 }
 0x1dc   :  { %v1099_v44 = vpack.c.bf16 %v1095_v47, %v1091_v46  ;;  %1851 = vmatprep.subr.bf16.mxu0 %v2184_v12  ;;  %v1170_v50 = vrot.slane %v1166_v24, %v171_v8  ;;  %v2147_v8 = vld [vmem:[%s2479_s4 + $0x18] sm:$0xff]   ;;  %v1455_v9 = vrot.slane %v1166_v24, %v175_v11  ;;  %v1523_v22 = vrot.slane %v1166_v24, %v179_v52 }
 0x1dd   :  { %1436 = vmatprep.mubr.bf16.mxu1 %v1100_v40  ;;  %v1585_v35 = vrot.slane %v1166_v24, %v183_v53  ;;  %v2186_v52 = vmov 0   ;;  %v1597_v53 = vrot.slane %v1166_v24, %v1596_v25 }
 0x1de   :  { %1437 = vmatmul.mubr.bf16.vlgmr.msra.gmra.mxu1 %v1099_v44  ;;  %1913 = vset.pattern.permute.xlu0 %v2186_v52 }
 0x1df   :  { %1852 = vmatpush3.bf16.msra.mxu0 %v2146_v15  ;;  %1861 = vmatprep.mubr.msk.bf16.mxu1 %vm2185_vm2, %v2184_v12 }
 0x1e0   :  { %1858 = vmatpush3.bf16.msra.mxu1 %v2147_v8  ;;  %1914 = vset.pattern.permute.xlu1 %v2186_v52 }
 0x1e1   :  { %1859 = vmatprep.subr.bf16.mxu1 %v2184_v12 }
 0x1e4   :  { %1860 = vmatpush3.bf16.msra.mxu1 %v2148_v3 }
 0x29a   :  { %v1815_v23 = vpop.f32.mrf.mxu0 }
 0x29c   :  { %v1816_v26 = vpop.f32.mrf.mxu0 }
 0x29d   :  { %v1817_v51 = vadd.f32 %v1816_v26, %v1815_v23 }
 0x29e   :  { %v1818_v27 = vpop.f32.mrf.mxu0  ;;  %v1837_v28 = vpop.f32.mrf.mxu1 }
 0x29f   :  { %v1398_v6 = vadd.f32 %v1817_v51, %v1170_v50 }
 0x2a0   :  { %v1819_v54 = vpop.f32.mrf.mxu0  ;;  %v1838_v55 = vpop.f32.mrf.mxu1 }
 0x2a1   :  { %v1820_v56 = vadd.f32 %v1819_v54, %v1818_v27  ;;  %v1839_v57 = vadd.f32 %v1838_v55, %v1837_v28 }
 0x2a2   :  { %v1840_v58 = vpop.f32.mrf.mxu1 }
 0x2a3   :  { %v1401_v60 = vadd.f32 %v1820_v56, %v1170_v50  ;;  %v1439_v61 = vadd.f32 %v1839_v57, %v1398_v6 }
 0x2a4   :  { %v1841_v59 = vpop.f32.mrf.mxu1 }
 0x2a5   :  { %v1842_v62 = vadd.f32 %v1841_v59, %v1840_v58  ;;  %v1445_v0 = vmax.f32 %v1439_v61, 0.0 }
 0x2a7   :  { %v1442_v63 = vadd.f32 %v1842_v62, %v1401_v60 }
 0x2a9   :  { %v1446_v1 = vmax.f32 %v1442_v63, 0.0 }
 0x2ab   :  { %v1447_v2 = vpack.c.bf16 %v1446_v1, %v1445_v0 }
 0x2ad   :  { %1854 = vmatmul.mubr.msk.bf16.vlgmr.msra.gmra.mxu0 %vm1468_vm3, %v1447_v2 }
 0x36d   :  { %v1506_v10 = vpop.f32.mrf.mxu0 }
 0x36e   :  { %v1507_v5 = vadd.f32 %v1506_v10, %v1455_v9 }
 0x36f   :  { %v1855_v4 = vpop.f32.mrf.mxu0 }
 0x370   :  { %v1513_v19 = vmax.f32 %v1507_v5, 0.0 }
 0x371   :  { %v1509_v13 = vpop.f32.mrf.mxu0 }
 0x372   :  { %v1510_v14 = vadd.f32 %v1509_v13, %v1455_v9 }
 0x373   :  { %v1856_v17 = vpop.f32.mrf.mxu0 }
 0x374   :  { %v1514_v20 = vmax.f32 %v1510_v14, 0.0 }
 0x376   :  { %v1515_v21 = vpack.c.bf16 %v1514_v20, %v1513_v19 }
 0x378   :  { %1862 = vmatmul.mubr.msk.bf16.vlgmr.msra.gmra.mxu1 %vm1468_vm3, %v1515_v21 }
 0x438   :  { %v1573_v29 = vpop.f32.mrf.mxu1 }
 0x439   :  { %v1574_v30 = vadd.f32 %v1573_v29, %v1523_v22 }
 0x43a   :  { %v1863_v11 = vpop.f32.mrf.mxu1 }
 0x43b   :  { %v1580_v36 = vmax.f32 %v1574_v30, 0.0 }
 0x43c   :  { %v1576_v38 = vpop.f32.mrf.mxu1 }
 0x43d   :  { %v1577_v32 = vadd.f32 %v1576_v38, %v1523_v22  ;;  %v1586_v41 = vmul.f32 %v1585_v35, %v1580_v36 }
 0x43e   :  { %v1864_v34 = vpop.f32.mrf.mxu1 }
 0x43f   :  { %v1581_v37 = vmax.f32 %v1577_v32, 0.0  ;;  %v1588_v39 = vsel %vm1468_vm3, %v1586_v41, 0.0 }
 0x440   :  { %1589 = vadd.xlane.f32.xlu0 %v1588_v39 }
 0x441   :  { %v1587_v18 = vmul.f32 %v1585_v35, %v1581_v37 }
 0x443   :  { %v1591_v31 = vsel %vm1468_vm3, %v1587_v18, 0.0 }
 0x444   :  { %1592 = vadd.xlane.f32.xlu1 %v1591_v31 }
 0x4c9   :  { %v1590_v33 = vpop.xlane.xlu0 %1589 }
 0x4ca   :  { %v1598_v42 = vadd.f32 %v1597_v53, %v1590_v33 }
 0x4cc   :  { %v1600_v43 = vmax.f32 %v1598_v42, 0.0 }
 0x4cd   :  { %v1593_v46 = vpop.xlane.xlu1 %1592 }
 0x4ce   :  { %v1602_v47 = vsub.f32 0.0, %v1600_v43  ;;  %v1599_v48 = vadd.f32 %v1597_v53, %v1593_v46 }
 0x4d0   :  { %v1604_v45 = vmul.f32 1.442695, %v1602_v47  ;;  %v1601_v40 = vmax.f32 %v1599_v48, 0.0 }
 0x4d2   :  { %2149 = vpow2.f32 %v1604_v45  ;;  %v1603_v44 = vsub.f32 0.0, %v1601_v40 }
 0x4d4   :  { %v1606_v49 = vmul.f32 1.442695, %v1603_v44 }
 0x4d6   :  { %2151 = vpow2.f32 %v1606_v49 }
 0x4df   :  { %v2150_v12 = vpop.eup %2149 }
 0x4e0   :  { %v1608_v15 = vadd.f32 1.0, %v2150_v12 }
 0x4e2   :  { %2153 = vrcp.f32 %v1608_v15 }
 0x4e3   :  { %v2152_v16 = vpop.eup %2151 }
 0x4e4   :  { %v1609_v23 = vadd.f32 1.0, %v2152_v16 }
 0x4e6   :  { %2155 = vrcp.f32 %v1609_v23 }
 0x4ef   :  { %v2154_v7 = vpop.eup %2153 }
 0x4f0   :  { %1614 = vperm.xlu0 %1913, %v2154_v7  }
 0x4f3   :  { %v2156_v24 = vpop.eup %2155 }
 0x4f4   :  { %1619 = vperm.xlu1 %1914, %v2156_v24  }
 0x56b   :  { %v1615_v26 = vpop.permute.xlu0 %1614 }
 0x56c   :  { %1622 = vst [vmem:[%s2480_s5] sm:$0xff] %v1615_v26 }
 0x56f   :  { %v1620_v27 = vpop.permute.xlu1 %1619 }
 0x570   :  { %1623 = vst [vmem:[%s2480_s5 + $0x8] sm:$0xff] %v1620_v27 }
 0x571   :  { %1628 = vsyncpa [#allocation3], 1 }

</bundles_post_ra>
